<compile_context>
chip_gen: v7x
topology: tpu7x:2x2x1
jax: 0.10.0
libtpu: 0.0.40
codegen_flags: <defaults>
</compile_context>

<pallas_src>
import functools

import jax
import jax.numpy as jnp
from jax import lax
from jax.experimental import pallas as pl
from jax.experimental.pallas import tpu as pltpu

_EPS = 1e-8                 # torch.nn.CosineSimilarity default eps
_MAX_SAFE_INV_TEMP = 80.0   # |sim| <= 1/temp; exp(80) ~ 5.5e34 << f32 max


def _pair_loss(s, t, *, inv_temp, inv_batch, stable_lse, mxu_bf16):
    """NT-Xent loss for one (B, D) seq/item pair. f32 in, f32 scalar out."""
    # Inverse row norms via rsqrt (EUP). Clamping the sum of squares to eps^2
    # clamps each norm to eps (avoids inf for zero rows; see eps note above).
    s_ss = jnp.sum(s * s, axis=-1, keepdims=True)                 # (B, 1)
    t_ss = jnp.sum(t * t, axis=-1, keepdims=True)                 # (B, 1)
    s_inv = lax.rsqrt(jnp.maximum(s_ss, _EPS * _EPS))             # 1 / max(||s||, eps)
    t_inv = lax.rsqrt(jnp.maximum(t_ss, _EPS * _EPS))             # 1 / max(||t||, eps)

    # Pre-normalize rows; fold 1/temp into the seq-side scale so the matmul
    # result is already `sim` (no (B, B) epilogue scaling, no transpose).
    s_n = s * (s_inv * inv_temp)                                  # (B, D)
    t_n = t * t_inv                                               # (B, D)

    # Positive logit per row = <s_n[i], t_n[i]>: VPU row-dot + XLU reduce,
    # independent of the MXU result FIFO, no diagonal mask.
    pos = jnp.sum(s_n * t_n, axis=-1, keepdims=True)              # (B, 1)

    # sim[i, j] = <s_n[i], t_n[j]> -- NT contraction straight onto the MXU.
    if mxu_bf16:
        lhs, rhs = s_n.astype(jnp.bfloat16), t_n.astype(jnp.bfloat16)
    else:
        lhs, rhs = s_n, t_n
    sim = lax.dot_general(
        lhs, rhs,
        dimension_numbers=(((1,), (1,)), ((), ())),
        preferred_element_type=jnp.float32,
    )                                                             # (B, B)

    # log-sum-exp over each full row (pos + all negatives; order irrelevant).
    if stable_lse:
        m = jnp.max(sim, axis=-1, keepdims=True)                  # (B, 1)
        lse = m + jnp.log(jnp.sum(jnp.exp(sim - m), axis=-1, keepdims=True))
    else:
        # Statically safe: |sim| <= 1/temp <= 80, exp cannot overflow in f32.
        lse = jnp.log(jnp.sum(jnp.exp(sim), axis=-1, keepdims=True))

    return jnp.sum(lse - pos) * inv_batch


# ----------------------------------------------------------------------------
# Single-pair path (matches the PyTorch module's forward signature exactly).
# ----------------------------------------------------------------------------
def _single_kernel(seq_ref, item_ref, out_ref, *, inv_temp, inv_batch,
                   stable_lse, mxu_bf16):
    s = seq_ref[...].astype(jnp.float32)   # (B, D)
    t = item_ref[...].astype(jnp.float32)  # (B, D)
    out_ref[0, 0] = _pair_loss(s, t, inv_temp=inv_temp, inv_batch=inv_batch,
                               stable_lse=stable_lse, mxu_bf16=mxu_bf16)


def contrastive_loss(seq_out, item_out, temp=0.5, *, mxu_bf16=None):
    """Pallas TPU implementation of ContrastiveLoss.forward (one pair)."""
    B, D = seq_out.shape
    inv_temp = float(1.0 / temp)
    if mxu_bf16 is None:
        mxu_bf16 = (B >= 256 or D >= 512)   # only pays off at real sizes
    kernel = functools.partial(
        _single_kernel,
        inv_temp=inv_temp,
        inv_batch=float(1.0 / B),
        stable_lse=inv_temp > _MAX_SAFE_INV_TEMP,
        mxu_bf16=bool(mxu_bf16),
    )
    out = pl.pallas_call(
        kernel,
        out_shape=jax.ShapeDtypeStruct((1, 1), jnp.float32),
        in_specs=[
            pl.BlockSpec((B, D), lambda: (0, 0)),
            pl.BlockSpec((B, D), lambda: (0, 0)),
        ],
        # Single grid point -> a scalar SMEM return is fine (no masked vst loop).
        out_specs=pl.BlockSpec(memory_space=pltpu.MemorySpace.SMEM),
    )(seq_out, item_out)
    return out[0, 0]


# ----------------------------------------------------------------------------
# Batched path: P independent (seq, item) pairs in ONE pallas_call.
# ----------------------------------------------------------------------------
def _batched_kernel(seq_ref, item_ref, out_ref, *, inv_temp, inv_batch,
                    stable_lse, mxu_bf16):
    s = seq_ref[0].astype(jnp.float32)   # (B, D) for pair p = program_id(0)
    t = item_ref[0].astype(jnp.float32)  # (B, D)
    loss = _pair_loss(s, t, inv_temp=inv_temp, inv_batch=inv_batch,
                      stable_lse=stable_lse, mxu_bf16=mxu_bf16)
    # Lane-dense unmasked store: broadcast the scalar across one (8, 128) vreg.
    out_ref[...] = jnp.broadcast_to(loss, (1, 8, 128)).astype(jnp.float32)


def contrastive_loss_batched(seq_out, item_out, temp=0.5, *, mxu_bf16=None):
    """P independent pairs, shapes (P, B, D); returns per-pair losses (P,).

    One pallas_call amortizes launch/DMA overhead over all P pairs; the pair
    axis is marked "parallel" so it shards across v7x's two TensorCores.
    """
    P, B, D = seq_out.shape
    assert item_out.shape == (P, B, D)
    inv_temp = float(1.0 / temp)
    if mxu_bf16 is None:
        mxu_bf16 = (B >= 256 or D >= 512)
    kernel = functools.partial(
        _batched_kernel,
        inv_temp=inv_temp,
        inv_batch=float(1.0 / B),
        stable_lse=inv_temp > _MAX_SAFE_INV_TEMP,
        mxu_bf16=bool(mxu_bf16),
    )
    out = pl.pallas_call(
        kernel,
        out_shape=jax.ShapeDtypeStruct((P, 8, 128), jnp.float32),
        grid=(P,),
        in_specs=[
            pl.BlockSpec((1, B, D), lambda p: (p, 0, 0)),
            pl.BlockSpec((1, B, D), lambda p: (p, 0, 0)),
        ],
        out_specs=pl.BlockSpec((1, 8, 128), lambda p: (p, 0, 0)),
        compiler_params=pltpu.CompilerParams(
            dimension_semantics=("parallel",)),
    )(seq_out, item_out)
    return out[:, 0, 0]   # tiny wrapper-side gather; losses are already final


# ----------------------------------------------------------------------------
# Pure-JAX reference mirroring the PyTorch module.
# ----------------------------------------------------------------------------
def _reference_loss(seq_out, item_out, temp=0.5):
    s = seq_out.astype(jnp.float32)
    t = item_out.astype(jnp.float32)
    sn = jnp.linalg.norm(s, axis=-1, keepdims=True)
    tn = jnp.linalg.norm(t, axis=-1, keepdims=True)
    sim = (s @ t.T) / jnp.maximum(sn * tn.T, _EPS) / temp
    pos = jnp.diag(sim)
    lse = jax.scipy.special.logsumexp(sim, axis=-1)
    return jnp.sum(lse - pos) / s.shape[0]


if __name__ == "__main__":
    B, D = 8, 32   # small (batch, hidden) implied by the module's forward
    P = 4          # number of pairs for the batched path
    key = jax.random.PRNGKey(0)
    k1, k2, k3, k4 = jax.random.split(key, 4)

    # --- single-pair path (exact forward() equivalent) ---
    seq_out = jax.random.normal(k1, (B, D), dtype=jnp.float32)
    item_out = jax.random.normal(k2, (B, D), dtype=jnp.float32)
    loss = jax.block_until_ready(contrastive_loss(seq_out, item_out, temp=0.5))
    ref = _reference_loss(seq_out, item_out, temp=0.5)
    assert jnp.allclose(loss, ref, rtol=1e-5, atol=1e-5), (loss, ref)

    # --- batched path (P pairs, one pallas_call, parallel pair axis) ---
    seq_b = jax.random.normal(k3, (P, B, D), dtype=jnp.float32)
    item_b = jax.random.normal(k4, (P, B, D), dtype=jnp.float32)
    losses = jax.block_until_ready(contrastive_loss_batched(seq_b, item_b, temp=0.5))
    refs = jnp.stack([_reference_loss(seq_b[p], item_b[p], temp=0.5)
                      for p in range(P)])
    assert losses.shape == (P,)
    assert jnp.allclose(losses, refs, rtol=1e-5, atol=1e-5), (losses, refs)

    print("KERNEL_OK")
</pallas_src>

<mosaic_0001>
module attributes {stable_mosaic.version = 11 : i64} {
  func.func @_single_kernel(%arg0: memref<8x32xf32, #tpu.memory_space<vmem>>, %arg1: memref<8x32xf32, #tpu.memory_space<vmem>>, %arg2: memref<1x1xf32, #tpu.memory_space<smem>>) attributes {dimension_semantics = [], scalar_prefetch = 0 : i64, scratch_operands = 0 : i64, tpu.core_type = #tpu.core_type<tc>} {
    %c0 = arith.constant 0 : index
    %c0_0 = arith.constant 0 : index
    %0 = vector.load %arg0[%c0, %c0_0] : memref<8x32xf32, #tpu.memory_space<vmem>>, vector<8x32xf32>
    %c0_1 = arith.constant 0 : index
    %c0_2 = arith.constant 0 : index
    %1 = vector.load %arg1[%c0_1, %c0_2] : memref<8x32xf32, #tpu.memory_space<vmem>>, vector<8x32xf32>
    %2 = arith.mulf %0, %0 : vector<8x32xf32>
    %cst = arith.constant dense<0.000000e+00> : vector<8xf32>
    %3 = vector.multi_reduction <add>, %2, %cst [1] : vector<8x32xf32> to vector<8xf32>
    %4 = vector.shape_cast %3 : vector<8xf32> to vector<8x1xf32>
    %5 = arith.mulf %1, %1 : vector<8x32xf32>
    %cst_3 = arith.constant dense<0.000000e+00> : vector<8xf32>
    %6 = vector.multi_reduction <add>, %5, %cst_3 [1] : vector<8x32xf32> to vector<8xf32>
    %7 = vector.shape_cast %6 : vector<8xf32> to vector<8x1xf32>
    %cst_4 = arith.constant 1.000000e-16 : f32
    %8 = vector.broadcast %cst_4 : f32 to vector<8x1xf32>
    %9 = arith.maximumf %4, %8 : vector<8x1xf32>
    %10 = math.rsqrt %9 : vector<8x1xf32>
    %cst_5 = arith.constant 1.000000e-16 : f32
    %11 = vector.broadcast %cst_5 : f32 to vector<8x1xf32>
    %12 = arith.maximumf %7, %11 : vector<8x1xf32>
    %13 = math.rsqrt %12 : vector<8x1xf32>
    %cst_6 = arith.constant 2.000000e+00 : f32
    %14 = vector.broadcast %cst_6 : f32 to vector<8x1xf32>
    %15 = arith.mulf %10, %14 : vector<8x1xf32>
    %16 = vector.broadcast %15 : vector<8x1xf32> to vector<8x32xf32>
    %17 = arith.mulf %0, %16 : vector<8x32xf32>
    %18 = vector.broadcast %13 : vector<8x1xf32> to vector<8x32xf32>
    %19 = arith.mulf %1, %18 : vector<8x32xf32>
    %20 = arith.mulf %17, %19 : vector<8x32xf32>
    %cst_7 = arith.constant dense<0.000000e+00> : vector<8xf32>
    %21 = vector.multi_reduction <add>, %20, %cst_7 [1] : vector<8x32xf32> to vector<8xf32>
    %22 = vector.shape_cast %21 : vector<8xf32> to vector<8x1xf32>
    %cst_8 = arith.constant dense<0.000000e+00> : vector<8x8xf32>
    %23 = tpu.matmul %17, %19, %cst_8 {dimension_numbers = #tpu.dot_dimension_numbers<[1], [1], [0], [0], [0, 0, 1, 0], [], []>} : vector<8x32xf32>, vector<8x32xf32>, vector<8x8xf32> -> vector<8x8xf32>
    %24 = math.exp %23 : vector<8x8xf32>
    %cst_9 = arith.constant dense<0.000000e+00> : vector<8xf32>
    %25 = vector.multi_reduction <add>, %24, %cst_9 [1] : vector<8x8xf32> to vector<8xf32>
    %26 = vector.shape_cast %25 : vector<8xf32> to vector<8x1xf32>
    %27 = math.log %26 : vector<8x1xf32>
    %28 = arith.subf %27, %22 : vector<8x1xf32>
    %29 = vector.shape_cast %28 : vector<8x1xf32> to vector<1x8x1xf32>
    %cst_10 = arith.constant dense<0.000000e+00> : vector<1xf32>
    %30 = vector.multi_reduction <add>, %29, %cst_10 [1, 2] : vector<1x8x1xf32> to vector<1xf32>
    %31 = vector.shape_cast %30 : vector<1xf32> to vector<1x1x1xf32>
    %32 = vector.extract %31[0, 0, 0] : f32 from vector<1x1x1xf32>
    %cst_11 = arith.constant 1.250000e-01 : f32
    %33 = arith.mulf %32, %cst_11 : f32
    %c0_12 = arith.constant 0 : index
    %c0_13 = arith.constant 0 : index
    %34 = memref.load %arg2[%c0_12, %c0_13] : memref<1x1xf32, #tpu.memory_space<smem>>
    memref.store %33, %arg2[%c0_12, %c0_13] : memref<1x1xf32, #tpu.memory_space<smem>>
    return
  }
}

</mosaic_0001>

<bundles_post_ra>
// kernel: tpu_custom_call.1
= control target key start
LH: loop header
LB: loop body
LE: loop exit
PB: predicated region body
PF: predicated region fallthrough
CT: control target
= control target key end

     0   :  { %7 = vsyncpa [#allocation3], 0  ;;  %s317_s0 = inlined_call_operand.hbm [shape: f32[8,32], index: 0, kind: input, shape index: {}]   ;;  %s318_s1 = inlined_call_operand.hbm [shape: f32[8,32], index: 1, kind: input, shape index: {}]   ;;  %s319_s2 = inlined_call_operand.hbm [shape: f32[1,1], index: 2, kind: output, shape index: {}]  }
   0x1   :  { %8 = vsyncpa [#allocation6], 0 }
   0x2   :  { %9 = vsyncpa [#allocation4], 0  ;;  %s256_s9 = smov [#allocation2]   ;;  %s257_s11 = smov [#allocation5]  }
   0x3   :  { %s16_s10 = sshll.u32 %s256_s9, 4  ;;  %s26_s12 = sshll.u32 %s257_s11, 4  ;;  %s17_s10 = int_to_ptr.vmem [resolvable:$true] %s16_s10  ;;  %s27_s12 = int_to_ptr.vmem [resolvable:$true] %s26_s12 }
   0x4   :  { %s196_s15 = scalar_lea.hbm %s317_s0, 128 }
   0x5   :  { %p197_p0 = scmp.ne.s32.totalorder %s317_s0, %s196_s15  ;;  %p200_p1 = scmp.lt.u32.totalorder %s196_s15, %s317_s0 }
   0x7   :  { %p202_p2 = pnand %p200_p1, %p197_p0 }
   0x9   :  { %205 = shalt.err (!%p202_p2)
}
   0xa   :  { %s206_s20 = scalar_lea.vmem %s17_s10, 128  ;;  %p211_p4 = scmp.lt.s32.totalorder %s17_s10, %s17_s10 }
   0xb   :  { %p207_p3 = scmp.ne.s32.totalorder %s17_s10, %s206_s20  ;;  %p212_p5 = scmp.lt.s32.totalorder %s206_s20, %s206_s20 }
   0xd   :  { %p213_p6 = por %p212_p5, %p211_p4 }
   0xf   :  { %p214_p7 = pnand %p213_p6, %p207_p3 }
  0x11   :  { %217 = shalt.err (!%p214_p7)
}
  0x12   :  { %19 = dma.hbm_to_vmem [thread:$0]  %s317_s0, 128, %s17_s10, [#allocation3]  }
  0x13   :  { %s218_s25 = scalar_lea.hbm %s318_s1, 128 }
  0x14   :  { %p219_p8 = scmp.ne.s32.totalorder %s318_s1, %s218_s25  ;;  %p222_p9 = scmp.lt.u32.totalorder %s218_s25, %s318_s1 }
  0x16   :  { %p224_p10 = pnand %p222_p9, %p219_p8 }
  0x18   :  { %227 = shalt.err (!%p224_p10)
}
  0x19   :  { %s228_s30 = scalar_lea.vmem %s27_s12, 128  ;;  %p233_p12 = scmp.lt.s32.totalorder %s27_s12, %s27_s12 }
  0x1a   :  { %p229_p11 = scmp.ne.s32.totalorder %s27_s12, %s228_s30  ;;  %p234_p13 = scmp.lt.s32.totalorder %s228_s30, %s228_s30 }
  0x1c   :  { %p235_p0 = por %p234_p13, %p233_p12 }
  0x1e   :  { %p236_p1 = pnand %p235_p0, %p229_p11 }
  0x20   :  { %239 = shalt.err (!%p236_p1)
}
  0x21   :  { %29 = dma.hbm_to_vmem [thread:$0]  %s318_s1, 128, %s27_s12, [#allocation6]  }
  0x22   :  { %250 = dma.done.wait [#allocation3], 128  }
  0x23   :  { %251 = vsyncadd [#allocation3], 4294967168 }
  0x24   :  { %252 = dma.done.wait [#allocation6], 128  }
  0x25   :  { %253 = vsyncadd [#allocation6], 4294967168  ;;  %v37_v0 = vld [vmem:[#allocation5] sm:$0xff]  ;;  %vm39_vm0 = vcmask 261120   ;;  %v36_v1 = vld [vmem:[#allocation2] sm:$0xff]  ;;  %v258_v6 = vmov 0.0  }
  0x26   :  { %v43_v2 = vmul.f32 %v37_v0, %v37_v0  ;;  %v38_v3 = vmul.f32 %v36_v1, %v36_v1  ;;  %176 = vmatprep.subr.mxu0 %v258_v6  ;;  %vm259_vm1 = vmmov 0   ;;  %vm136_vm2 = vcmask 64512   ;;  %s240_s7 = scalar_lea.hbm %s319_s2, 16 }
  0x27   :  { %178 = vmatprep.mubr.msk.f32.mxu0 %vm259_vm1, %v258_v6  ;;  %vm143_vm3 = vcmask 7168   ;;  %p241_p2 = scmp.ne.s32.totalorder %s319_s2, %s240_s7  ;;  %p244_p3 = scmp.lt.u32.totalorder %s240_s7, %s319_s2 }
  0x28   :  { %v44_v4 = vsel %vm39_vm0, %v43_v2, 0.0  ;;  %v40_v5 = vsel %vm39_vm0, %v38_v3, 0.0 }
  0x29   :  { %45 = vadd.xlane.f32.xlu0 %v44_v4  ;;  %p246_p4 = pnand %p244_p3, %p241_p2 }
  0x2d   :  { %41 = vadd.xlane.f32.xlu0 %v40_v5 }
  0xb6   :  { %v46_v7 = vpop.xlane.xlu0 %45 }
  0xb7   :  { %v49_v8 = vmax.f32 %v46_v7, 1e-16 }
  0xb9   :  { %188 = vrsqrt.f32 %v49_v8 }
  0xba   :  { %v42_v9 = vpop.xlane.xlu0 %41 }
  0xbb   :  { %v47_v10 = vmax.f32 %v42_v9, 1e-16 }
  0xbd   :  { %190 = vrsqrt.f32 %v47_v10 }
  0xc3   :  { %v189_v11 = vpop.eup %188 }
  0xc4   :  { %v53_v12 = vmul.f32 %v189_v11, %v37_v0 }
  0xc6   :  { %177 = vmatpush3.xpose.msk.msra.mxu0 %vm39_vm0, %v53_v12 }
  0xc7   :  { %v191_v13 = vpop.eup %190 }
  0xc8   :  { %v51_v14 = vmul.f32 2.0, %v191_v13 }
  0xca   :  { %v52_v15 = vmul.f32 %v51_v14, %v36_v1 }
  0xcc   :  { %179 = vmatmul.mubr.msk.f32.vlgmr.msra.gmra.mrb[0].mxu0 %vm39_vm0, %v52_v15  ;;  %v54_v16 = vmul.f32 %v53_v12, %v52_v15 }
  0xce   :  { %v55_v22 = vsel %vm39_vm0, %v54_v16, 0.0 }
 0x19f   :  { %v130_v17 = vpop.f32.mrb[0].mxu0 }
 0x1a0   :  { %v134_v18 = vmul.f32 1.442695, %v130_v17  ;;  %v180_v19 = vpop.f32.mrb[1].mxu0 }
 0x1a2   :  { %192 = vpow2.f32 %v134_v18 }
 0x1ac   :  { %v193_v20 = vpop.eup %192 }
 0x1ad   :  { %v137_v21 = vsel %vm136_vm2, %v193_v20, 0.0 }
 0x1ae   :  { %138 = vadd.xlane.f32.xlu1 %v137_v21 }
 0x1b2   :  { %56 = vadd.xlane.f32.xlu1 %v55_v22 }
 0x23b   :  { %v139_v23 = vpop.xlane.xlu1 %138 }
 0x23c   :  { %194 = vlog2.f32 %v139_v23 }
 0x23f   :  { %v57_v26 = vpop.xlane.xlu1 %56 }
 0x246   :  { %v195_v24 = vpop.eup %194 }
 0x247   :  { %v141_v25 = vmul.f32 0.6931472, %v195_v24 }
 0x249   :  { %v142_v27 = vsub.f32 %v141_v25, %v57_v26 }
 0x24b   :  { %v144_v28 = vsel %vm143_vm3, %v142_v27, 0.0 }
 0x24c   :  { %145 = vadd.xlane.f32.xlu0 %v144_v28 }
 0x2d9   :  { %v146_v29 = vpop.xlane.xlu0 %145 }
 0x2da   :  { %v147_v30 = vrot.slane %v146_v29, 4 }
 0x2dc   :  { %v148_v31 = vadd.f32 %v147_v30, %v146_v29 }
 0x2de   :  { %v149_v32 = vrot.slane %v148_v31, 2 }
 0x2e0   :  { %v150_v33 = vadd.f32 %v149_v32, %v148_v31 }
 0x2e2   :  { %v151_v34 = vrot.slane %v150_v33, 1 }
 0x2e4   :  { %v152_v35 = vadd.f32 %v151_v34, %v150_v33 }
 0x2e6   :  { %181 = vpush %v152_v35 }
 0x317   :  { %s182_s1 = spop %181 }
 0x318   :  { %s154_s4 = smul.f32 0.125, %s182_s1 }
 0x31a   :  { %156 = sst [smem:[#allocation7]] %s154_s4 }
 0x31b   :  { %249 = shalt.err (!%p246_p4)
}
 0x31c   :  { %s260_s12 = smov [#allocation7]  }
 0x31d   :  { %164 = dma.smem_to_hbm %s260_s12, 16, %s319_s2, [#allocation4]  }
 0x31e   :  { %254 = dma.done.wait [#allocation4], 16  }
 0x31f   :  { %255 = vsyncadd [#allocation4], 4294967280 }
 0x320   :  { %168 = sfence }
 0x321   :  { %169 = vsyncpa [#allocation3], 1 }
 0x322   :  { %170 = vsyncpa [#allocation6], 1 }
 0x323   :  { %171 = vsyncpa [#allocation4], 1 }

</bundles_post_ra>
